<compile_context>
chip_gen: v7x
topology: tpu7x:2x2x1
jax: 0.10.0
libtpu: 0.0.40
codegen_flags: <defaults>
</compile_context>

<pallas_src>
import functools

import jax
import jax.numpy as jnp
from jax.experimental import pallas as pl
from jax.experimental.pallas import tpu as pltpu


def _round_up(v, m):
    return ((v + m - 1) // m) * m


def _conv_module_kernel(scalars_ref, x_ref, xla_ref, ga_a_ref, be_a_ref,
                        ga_g_ref, be_g_ref, dw_ref, bias_ref, o_ref, ext_ref,
                        *, kernel_size, pad_l, pad_r, halo, look, t_tile,
                        n_tiles, rem, seq_len, ln_eps, inv_d):
    K = kernel_size
    tT = t_tile
    D = x_ref.shape[-1]
    f32 = jnp.float32
    lo = halo - pad_l            # scratch row of the first conv tap
    data0 = halo                 # scratch row where the current tile starts
    rh0 = halo + tT              # scratch row where the right halo starts
    t = pl.program_id(1)

    def layer_norm_glu(rows):
        # LayerNorm + (folded) pw_conv_1 + GLU, computed in f32.
        mean = jnp.sum(rows, axis=-1, keepdims=True) * inv_d
        cent = rows - mean
        var = jnp.sum(cent * cent, axis=-1, keepdims=True) * inv_d
        normed = cent * jax.lax.rsqrt(var + ln_eps)
        a = normed * ga_a_ref[...] + be_a_ref[...]       # pw1 channel 0 folded
        g = normed * ga_g_ref[...] + be_g_ref[...]       # pw1 channel 1 folded
        return a * jax.nn.sigmoid(g)

    # -- t == 0: zero only the halo / alignment rows (the data region is fully
    #    overwritten every step; zeroing it would be dead vector stores). --
    @pl.when(t == 0)
    def _():
        if halo > 0:
            ext_ref[pl.ds(0, halo), :] = jnp.zeros((halo, D), f32)
        tail = ext_ref.shape[0] - rh0
        ext_ref[pl.ds(rh0, tail), :] = jnp.zeros((tail, D), f32)

    # -- left halo: carry the previous tile's last pad_l rows.  Skipped at
    #    t == 0 where the zero-init supplies the conv's left zero padding. --
    if pad_l > 0:
        @pl.when(t > 0)
        def _():
            ext_ref[pl.ds(lo, pad_l), :] = ext_ref[pl.ds(rh0 - pad_l, pad_l), :]

    # -- current tile: LN + GLU, stored into the scratch data region. --
    glu = layer_norm_glu(x_ref[0].astype(f32))
    ext_ref[pl.ds(data0, tT), :] = glu
    if rem:
        # Ragged last tile: rows >= seq_len were OOB reads; zero them so the
        # depthwise conv sees exact zero padding beyond the sequence end.
        @pl.when(t == n_tiles - 1)
        def _():
            ext_ref[pl.ds(data0 + rem, tT - rem), :] = jnp.zeros(
                (tT - rem, D), f32)

    # -- right halo (centered conv only): recompute GLU on the first pad_r
    #    rows of the *next* tile (few rows; cheaper than an output lag plus a
    #    flush step), masking rows past the sequence end to zero. --
    if pad_r > 0:
        la = layer_norm_glu(xla_ref[0].astype(f32))
        row = (t + 1) * tT + jax.lax.broadcasted_iota(jnp.int32, (look, 1), 0)
        la = jnp.where(row < seq_len, la, 0.0)
        ext_ref[pl.ds(rh0, pad_r), :] = la[:pad_r]

    # -- depthwise conv (BatchNorm folded into weights): one sublane-aligned
    #    (tT + 8, D) window load per 8-row tap group; per-tap shifts go to the
    #    XLU via pltpu.roll; two partial accumulators shorten the dep chain. --
    dw = dw_ref[...]                                     # (K, D)
    win = tT + 8
    acc0 = None
    acc1 = None
    cur_base = None
    wbuf = None
    for j in range(K):                                   # static unroll
        s = lo + j
        base = (s // 8) * 8
        if base != cur_base:
            cur_base = base
            wbuf = ext_ref[pl.ds(base, win), :]          # aligned window load
        r = s - base
        tap = wbuf if r == 0 else pltpu.roll(wbuf, shift=win - r, axis=0)
        term = tap[:tT] * dw[j:j + 1, :]
        if j % 2 == 0:
            acc0 = term if acc0 is None else acc0 + term
        else:
            acc1 = term if acc1 is None else acc1 + term
    acc = acc0 if acc1 is None else acc0 + acc1

    # -- BN bias (folded) + ReLU + pw_conv_2 (scalar affine); dropout = id. --
    y = jnp.maximum(acc + bias_ref[...], 0.0)
    y = scalars_ref[0] * y + scalars_ref[1]
    o_ref[0] = y.astype(o_ref.dtype)


def conv_module_forward(x, params, kernel_size, causal=False, ln_eps=1e-5,
                        bn_eps=1e-5, time_tile=1024):
    B, T, D = x.shape
    K = kernel_size
    pad_l = K - 1 if causal else (K - 1) // 2
    pad_r = 0 if causal else (K - 1) - pad_l
    halo = _round_up(pad_l, 8)                  # left-halo rows in the scratch
    look = 8 if pad_r == 0 else _round_up(pad_r, 8)   # lookahead block rows

    # Time tile: multiple of `look` (itself a multiple of 8) so the lookahead
    # BlockSpec index is a whole block; sized against a conservative,
    # v7x-safe VMEM budget (~12 live f32 slabs <= ~22 MiB).
    align = look
    d_lanes = _round_up(D, 128)
    budget_rows = max(align, (22 * 1024 * 1024) // (12 * 4 * d_lanes))
    tT = min(int(time_tile), T, budget_rows)
    tT = _round_up(max(tT, pad_l, 1), align)
    nT = (T + tT - 1) // tT
    rem = T % tT

    # Scratch rows: every aligned tap-group window load (tT + 8 rows) fits.
    max_base = ((halo + pad_r) // 8) * 8
    srows = max_base + tT + 8

    f32 = jnp.float32

    def vec(v):
        return jnp.asarray(v, f32).reshape(1, D)

    # --- host-side parameter folding (tiny, O(K*D)) ---
    gamma = jnp.asarray(params["ln_gamma"], f32)
    beta = jnp.asarray(params["ln_beta"], f32)
    w1 = jnp.asarray(params["pw1_w"], f32)
    b1 = jnp.asarray(params["pw1_b"], f32)
    ga_a = vec(w1[0] * gamma)                  # pw1 ch0 folded into LN affine
    be_a = vec(w1[0] * beta + b1[0])
    ga_g = vec(w1[1] * gamma)                  # pw1 ch1 folded into LN affine
    be_g = vec(w1[1] * beta + b1[1])
    bn_s = jnp.asarray(params["bn_gamma"], f32) / jnp.sqrt(
        jnp.asarray(params["bn_var"], f32) + bn_eps)
    bn_b = (jnp.asarray(params["bn_beta"], f32)
            - jnp.asarray(params["bn_mean"], f32) * bn_s)
    dw_f = jnp.asarray(params["dw_w"], f32) * bn_s[None, :]          # (K, D)
    bias_f = vec(bn_s * jnp.asarray(params["dw_b"], f32) + bn_b)
    scalars = jnp.stack([jnp.asarray(params["pw2_w"], f32).reshape(()),
                         jnp.asarray(params["pw2_b"], f32).reshape(())])

    kernel = functools.partial(
        _conv_module_kernel, kernel_size=K, pad_l=pad_l, pad_r=pad_r,
        halo=halo, look=look, t_tile=tT, n_tiles=nT, rem=rem, seq_len=T,
        ln_eps=float(ln_eps), inv_d=1.0 / D)

    la_stride = tT // look
    la_last = (T - 1) // look

    out = pl.pallas_call(
        kernel,
        out_shape=jax.ShapeDtypeStruct((B, T, D), x.dtype),
        grid=(B, nT),
        in_specs=[
            pl.BlockSpec(memory_space=pltpu.MemorySpace.SMEM),        # pw2 w,b
            pl.BlockSpec((1, tT, D), lambda b, t: (b, t, 0)),         # x tile
            pl.BlockSpec((1, look, D),
                         lambda b, t: (b, jnp.minimum((t + 1) * la_stride,
                                                      la_last), 0)),  # next-tile x
            pl.BlockSpec((1, D), lambda b, t: (0, 0)),                # ga_a
            pl.BlockSpec((1, D), lambda b, t: (0, 0)),                # be_a
            pl.BlockSpec((1, D), lambda b, t: (0, 0)),                # ga_g
            pl.BlockSpec((1, D), lambda b, t: (0, 0)),                # be_g
            pl.BlockSpec((K, D), lambda b, t: (0, 0)),                # dw (BN folded)
            pl.BlockSpec((1, D), lambda b, t: (0, 0)),                # bias (BN folded)
        ],
        out_specs=pl.BlockSpec((1, tT, D), lambda b, t: (b, t, 0)),
        scratch_shapes=[pltpu.VMEM((srows, D), f32)],
        compiler_params=pltpu.CompilerParams(
            dimension_semantics=("parallel", "arbitrary"),
            vmem_limit_bytes=48 * 1024 * 1024),
    )(scalars, x, x, ga_a, be_a, ga_g, be_g, dw_f, bias_f)
    return out


def reference_forward(x, p, kernel_size, causal=False,
                      ln_eps=1e-5, bn_eps=1e-5):
    """Pure-JAX reference (same math, batched, f32)."""
    K = kernel_size
    T = x.shape[1]
    x = jnp.asarray(x, jnp.float32)
    mean = x.mean(-1, keepdims=True)
    cent = x - mean
    var = (cent * cent).mean(-1, keepdims=True)
    ln = cent * jax.lax.rsqrt(var + ln_eps) * p["ln_gamma"] + p["ln_beta"]
    a = p["pw1_w"][0] * ln + p["pw1_b"][0]
    g = p["pw1_w"][1] * ln + p["pw1_b"][1]
    glu = a * jax.nn.sigmoid(g)
    pad_l = K - 1 if causal else (K - 1) // 2
    pad_r = 0 if causal else (K - 1) - pad_l
    xp = jnp.pad(glu, ((0, 0), (pad_l, pad_r), (0, 0)))
    y = sum(xp[:, j:j + T, :] * p["dw_w"][j][None, None, :] for j in range(K))
    y = y + p["dw_b"]
    bn_s = p["bn_gamma"] / jnp.sqrt(p["bn_var"] + bn_eps)
    bn_b = p["bn_beta"] - p["bn_mean"] * bn_s
    y = jnp.maximum(y * bn_s + bn_b, 0.0)
    return p["pw2_w"] * y + p["pw2_b"]


def make_params(key, input_dim, kernel_size):
    ks = jax.random.split(key, 12)
    D, K = input_dim, kernel_size
    return {
        "ln_gamma": 1.0 + 0.1 * jax.random.normal(ks[0], (D,)),
        "ln_beta": 0.1 * jax.random.normal(ks[1], (D,)),
        "pw1_w": 0.5 * jax.random.normal(ks[2], (2,)),   # Conv2d(1,2,1) weight
        "pw1_b": 0.1 * jax.random.normal(ks[3], (2,)),
        "dw_w": 0.2 * jax.random.normal(ks[4], (K, D)),  # depthwise kernel
        "dw_b": 0.1 * jax.random.normal(ks[5], (D,)),
        "bn_gamma": 1.0 + 0.1 * jax.random.normal(ks[6], (D,)),
        "bn_beta": 0.1 * jax.random.normal(ks[7], (D,)),
        "bn_mean": 0.05 * jax.random.normal(ks[8], (D,)),
        "bn_var": jax.random.uniform(ks[9], (D,), minval=0.5, maxval=1.5),
        "pw2_w": 0.7 * jax.random.normal(ks[10], ()),    # Conv2d(1,1,1) weight
        "pw2_b": 0.1 * jax.random.normal(ks[11], ()),
    }


def _check(x, params, K, causal, tol, **kw):
    out = jax.block_until_ready(
        conv_module_forward(x, params, kernel_size=K, causal=causal, **kw))
    ref = reference_forward(x, params, kernel_size=K, causal=causal)
    assert out.shape == x.shape, (out.shape, x.shape)
    err = float(jnp.max(jnp.abs(jnp.asarray(out, jnp.float32) - ref)))
    assert err <= tol, f"max abs err {err} > {tol} (K={K}, causal={causal})"


if __name__ == "__main__":
    key = jax.random.PRNGKey(0)

    # Case 1: small conformer-like block, centered conv, single time tile.
    k_x, k_p, key = jax.random.split(key, 3)
    x = jax.random.normal(k_x, (2, 16, 32), dtype=jnp.float32)
    params = make_params(k_p, 32, 5)
    _check(x, params, K=5, causal=False, tol=1e-4)

    # Case 2: ragged time axis with a small forced time tile so the streamed
    # halo carry, ragged-tail masking and lookahead paths are exercised.
    k_x, k_p, key = jax.random.split(key, 3)
    x = jax.random.normal(k_x, (2, 20, 32), dtype=jnp.float32)
    params = make_params(k_p, 32, 3)
    for causal in (True, False):
        _check(x, params, K=3, causal=causal, tol=1e-4, time_tile=8)

    # Case 3: wide kernel (K=19) -> multiple aligned tap groups, 16-row
    # lookahead block, lookahead longer than the ragged remainder.
    k_x, k_p, key = jax.random.split(key, 3)
    x = jax.random.normal(k_x, (1, 40, 32), dtype=jnp.float32)
    params = make_params(k_p, 32, 19)
    for causal in (True, False):
        _check(x, params, K=19, causal=causal, tol=1e-4, time_tile=16)

    # Case 4: bf16 input/output end-to-end (statistics and conv in f32).
    k_x, k_p, key = jax.random.split(key, 3)
    x = jax.random.normal(k_x, (2, 48, 128), dtype=jnp.float32
                          ).astype(jnp.bfloat16)
    params = make_params(k_p, 128, 7)
    _check(x, params, K=7, causal=False, tol=1e-1, time_tile=16)

    print("KERNEL_OK")
</pallas_src>

<mosaic_0001>
module attributes {stable_mosaic.version = 11 : i64} {
  func.func @_conv_module_kernel(%arg0: i32, %arg1: i32, %arg2: memref<2xf32, #tpu.memory_space<smem>>, %arg3: memref<1x16x32xf32, #tpu.memory_space<vmem>>, %arg4: memref<1x8x32xf32, #tpu.memory_space<vmem>>, %arg5: memref<1x32xf32, #tpu.memory_space<vmem>>, %arg6: memref<1x32xf32, #tpu.memory_space<vmem>>, %arg7: memref<1x32xf32, #tpu.memory_space<vmem>>, %arg8: memref<1x32xf32, #tpu.memory_space<vmem>>, %arg9: memref<5x32xf32, #tpu.memory_space<vmem>>, %arg10: memref<1x32xf32, #tpu.memory_space<vmem>>, %arg11: memref<1x16x32xf32, #tpu.memory_space<vmem>>, %arg12: memref<32x32xf32, #tpu.memory_space<vmem>>) attributes {dimension_semantics = [#tpu.dimension_semantics<parallel>, #tpu.dimension_semantics<arbitrary>], iteration_bounds = array<i64: 2, 1>, scalar_prefetch = 0 : i64, scratch_operands = 1 : i64, tpu.core_type = #tpu.core_type<tc>, window_params = [{transform_indices = @transform_0, window_bounds = array<i64: 2>}, {transform_indices = @transform_1, window_bounds = array<i64: 1, 16, 32>}, {transform_indices = @transform_2, window_bounds = array<i64: 1, 8, 32>}, {pipeline_mode = #tpu.pipeline_mode<synchronous>, transform_indices = @transform_3, window_bounds = array<i64: 1, 32>}, {pipeline_mode = #tpu.pipeline_mode<synchronous>, transform_indices = @transform_4, window_bounds = array<i64: 1, 32>}, {pipeline_mode = #tpu.pipeline_mode<synchronous>, transform_indices = @transform_5, window_bounds = array<i64: 1, 32>}, {pipeline_mode = #tpu.pipeline_mode<synchronous>, transform_indices = @transform_6, window_bounds = array<i64: 1, 32>}, {pipeline_mode = #tpu.pipeline_mode<synchronous>, transform_indices = @transform_7, window_bounds = array<i64: 5, 32>}, {pipeline_mode = #tpu.pipeline_mode<synchronous>, transform_indices = @transform_8, window_bounds = array<i64: 1, 32>}, {transform_indices = @transform_9, window_bounds = array<i64: 1, 16, 32>}]} {
    %c0_i32 = arith.constant 0 : i32
    %0 = arith.cmpi eq, %arg1, %c0_i32 : i32
    %1 = arith.extui %0 : i1 to i32
    %c0_i32_0 = arith.constant 0 : i32
    %2 = arith.cmpi ne, %1, %c0_i32_0 : i32
    scf.if %2 {
      %cst_52 = arith.constant 0.000000e+00 : f32
      %137 = vector.broadcast %cst_52 : f32 to vector<8x32xf32>
      %c0_53 = arith.constant 0 : index
      %c0_54 = arith.constant 0 : index
      %138 = vector.load %arg12[%c0_53, %c0_54] : memref<32x32xf32, #tpu.memory_space<vmem>>, vector<8x32xf32>
      tpu.vector_store %arg12[%c0_53, %c0_54], %137 {strides = array<i32>} : memref<32x32xf32, #tpu.memory_space<vmem>>, vector<8x32xf32>,
      %cst_55 = arith.constant 0.000000e+00 : f32
      %139 = vector.broadcast %cst_55 : f32 to vector<8x32xf32>
      %c24_56 = arith.constant 24 : index
      %c0_57 = arith.constant 0 : index
      %140 = vector.load %arg12[%c24_56, %c0_57] : memref<32x32xf32, #tpu.memory_space<vmem>>, vector<8x32xf32>
      tpu.vector_store %arg12[%c24_56, %c0_57], %139 {strides = array<i32>} : memref<32x32xf32, #tpu.memory_space<vmem>>, vector<8x32xf32>,
    } else {
    }
    %c0_i32_1 = arith.constant 0 : i32
    %3 = arith.cmpi sgt, %arg1, %c0_i32_1 : i32
    %4 = arith.extui %3 : i1 to i32
    %c0_i32_2 = arith.constant 0 : i32
    %5 = arith.cmpi ne, %4, %c0_i32_2 : i32
    scf.if %5 {
      %c22 = arith.constant 22 : index
      %c0_52 = arith.constant 0 : index
      %137 = vector.load %arg12[%c22, %c0_52] : memref<32x32xf32, #tpu.memory_space<vmem>>, vector<2x32xf32>
      %c6 = arith.constant 6 : index
      %c0_53 = arith.constant 0 : index
      %138 = vector.load %arg12[%c6, %c0_53] : memref<32x32xf32, #tpu.memory_space<vmem>>, vector<2x32xf32>
      tpu.vector_store %arg12[%c6, %c0_53], %137 {strides = array<i32>} : memref<32x32xf32, #tpu.memory_space<vmem>>, vector<2x32xf32>,
    } else {
    }
    %c0 = arith.constant 0 : index
    %c0_3 = arith.constant 0 : index
    %c0_4 = arith.constant 0 : index
    %6 = vector.load %arg3[%c0, %c0_3, %c0_4] : memref<1x16x32xf32, #tpu.memory_space<vmem>>, vector<1x16x32xf32>
    %7 = vector.shape_cast %6 : vector<1x16x32xf32> to vector<16x32xf32>
    %cst = arith.constant dense<0.000000e+00> : vector<16xf32>
    %8 = vector.multi_reduction <add>, %7, %cst [1] : vector<16x32xf32> to vector<16xf32>
    %9 = vector.shape_cast %8 : vector<16xf32> to vector<16x1xf32>
    %cst_5 = arith.constant 3.125000e-02 : f32
    %10 = vector.broadcast %cst_5 : f32 to vector<16x1xf32>
    %11 = arith.mulf %9, %10 : vector<16x1xf32>
    %12 = vector.broadcast %11 : vector<16x1xf32> to vector<16x32xf32>
    %13 = arith.subf %7, %12 : vector<16x32xf32>
    %14 = arith.mulf %13, %13 : vector<16x32xf32>
    %cst_6 = arith.constant dense<0.000000e+00> : vector<16xf32>
    %15 = vector.multi_reduction <add>, %14, %cst_6 [1] : vector<16x32xf32> to vector<16xf32>
    %16 = vector.shape_cast %15 : vector<16xf32> to vector<16x1xf32>
    %cst_7 = arith.constant 3.125000e-02 : f32
    %17 = vector.broadcast %cst_7 : f32 to vector<16x1xf32>
    %18 = arith.mulf %16, %17 : vector<16x1xf32>
    %cst_8 = arith.constant 9.99999974E-6 : f32
    %19 = vector.broadcast %cst_8 : f32 to vector<16x1xf32>
    %20 = arith.addf %18, %19 : vector<16x1xf32>
    %21 = math.rsqrt %20 : vector<16x1xf32>
    %22 = vector.broadcast %21 : vector<16x1xf32> to vector<16x32xf32>
    %23 = arith.mulf %13, %22 : vector<16x32xf32>
    %c0_9 = arith.constant 0 : index
    %c0_10 = arith.constant 0 : index
    %24 = vector.load %arg5[%c0_9, %c0_10] : memref<1x32xf32, #tpu.memory_space<vmem>>, vector<1x32xf32>
    %25 = vector.broadcast %24 : vector<1x32xf32> to vector<16x32xf32>
    %26 = arith.mulf %23, %25 : vector<16x32xf32>
    %c0_11 = arith.constant 0 : index
    %c0_12 = arith.constant 0 : index
    %27 = vector.load %arg6[%c0_11, %c0_12] : memref<1x32xf32, #tpu.memory_space<vmem>>, vector<1x32xf32>
    %28 = vector.broadcast %27 : vector<1x32xf32> to vector<16x32xf32>
    %29 = arith.addf %26, %28 : vector<16x32xf32>
    %c0_13 = arith.constant 0 : index
    %c0_14 = arith.constant 0 : index
    %30 = vector.load %arg7[%c0_13, %c0_14] : memref<1x32xf32, #tpu.memory_space<vmem>>, vector<1x32xf32>
    %31 = vector.broadcast %30 : vector<1x32xf32> to vector<16x32xf32>
    %32 = arith.mulf %23, %31 : vector<16x32xf32>
    %c0_15 = arith.constant 0 : index
    %c0_16 = arith.constant 0 : index
    %33 = vector.load %arg8[%c0_15, %c0_16] : memref<1x32xf32, #tpu.memory_space<vmem>>, vector<1x32xf32>
    %34 = vector.broadcast %33 : vector<1x32xf32> to vector<16x32xf32>
    %35 = arith.addf %32, %34 : vector<16x32xf32>
    %36 = arith.negf %35 : vector<16x32xf32>
    %37 = math.exp %36 : vector<16x32xf32>
    %cst_17 = arith.constant 1.000000e+00 : f32
    %38 = vector.broadcast %cst_17 : f32 to vector<16x32xf32>
    %39 = arith.addf %38, %37 : vector<16x32xf32>
    %40 = arith.divf %38, %39 : vector<16x32xf32>
    %41 = arith.mulf %29, %40 : vector<16x32xf32>
    %c8 = arith.constant 8 : index
    %c0_18 = arith.constant 0 : index
    %42 = vector.load %arg12[%c8, %c0_18] : memref<32x32xf32, #tpu.memory_space<vmem>>, vector<16x32xf32>
    tpu.vector_store %arg12[%c8, %c0_18], %41 {strides = array<i32>} : memref<32x32xf32, #tpu.memory_space<vmem>>, vector<16x32xf32>,
    %c0_19 = arith.constant 0 : index
    %c0_20 = arith.constant 0 : index
    %c0_21 = arith.constant 0 : index
    %43 = vector.load %arg4[%c0_19, %c0_20, %c0_21] : memref<1x8x32xf32, #tpu.memory_space<vmem>>, vector<1x8x32xf32>
    %44 = vector.shape_cast %43 : vector<1x8x32xf32> to vector<8x32xf32>
    %cst_22 = arith.constant dense<0.000000e+00> : vector<8xf32>
    %45 = vector.multi_reduction <add>, %44, %cst_22 [1] : vector<8x32xf32> to vector<8xf32>
    %46 = vector.shape_cast %45 : vector<8xf32> to vector<8x1xf32>
    %cst_23 = arith.constant 3.125000e-02 : f32
    %47 = vector.broadcast %cst_23 : f32 to vector<8x1xf32>
    %48 = arith.mulf %46, %47 : vector<8x1xf32>
    %49 = vector.broadcast %48 : vector<8x1xf32> to vector<8x32xf32>
    %50 = arith.subf %44, %49 : vector<8x32xf32>
    %51 = arith.mulf %50, %50 : vector<8x32xf32>
    %cst_24 = arith.constant dense<0.000000e+00> : vector<8xf32>
    %52 = vector.multi_reduction <add>, %51, %cst_24 [1] : vector<8x32xf32> to vector<8xf32>
    %53 = vector.shape_cast %52 : vector<8xf32> to vector<8x1xf32>
    %cst_25 = arith.constant 3.125000e-02 : f32
    %54 = vector.broadcast %cst_25 : f32 to vector<8x1xf32>
    %55 = arith.mulf %53, %54 : vector<8x1xf32>
    %cst_26 = arith.constant 9.99999974E-6 : f32
    %56 = vector.broadcast %cst_26 : f32 to vector<8x1xf32>
    %57 = arith.addf %55, %56 : vector<8x1xf32>
    %58 = math.rsqrt %57 : vector<8x1xf32>
    %59 = vector.broadcast %58 : vector<8x1xf32> to vector<8x32xf32>
    %60 = arith.mulf %50, %59 : vector<8x32xf32>
    %c0_27 = arith.constant 0 : index
    %c0_28 = arith.constant 0 : index
    %61 = vector.load %arg5[%c0_27, %c0_28] : memref<1x32xf32, #tpu.memory_space<vmem>>, vector<1x32xf32>
    %62 = vector.broadcast %61 : vector<1x32xf32> to vector<8x32xf32>
    %63 = arith.mulf %60, %62 : vector<8x32xf32>
    %c0_29 = arith.constant 0 : index
    %c0_30 = arith.constant 0 : index
    %64 = vector.load %arg6[%c0_29, %c0_30] : memref<1x32xf32, #tpu.memory_space<vmem>>, vector<1x32xf32>
    %65 = vector.broadcast %64 : vector<1x32xf32> to vector<8x32xf32>
    %66 = arith.addf %63, %65 : vector<8x32xf32>
    %c0_31 = arith.constant 0 : index
    %c0_32 = arith.constant 0 : index
    %67 = vector.load %arg7[%c0_31, %c0_32] : memref<1x32xf32, #tpu.memory_space<vmem>>, vector<1x32xf32>
    %68 = vector.broadcast %67 : vector<1x32xf32> to vector<8x32xf32>
    %69 = arith.mulf %60, %68 : vector<8x32xf32>
    %c0_33 = arith.constant 0 : index
    %c0_34 = arith.constant 0 : index
    %70 = vector.load %arg8[%c0_33, %c0_34] : memref<1x32xf32, #tpu.memory_space<vmem>>, vector<1x32xf32>
    %71 = vector.broadcast %70 : vector<1x32xf32> to vector<8x32xf32>
    %72 = arith.addf %69, %71 : vector<8x32xf32>
    %73 = arith.negf %72 : vector<8x32xf32>
    %74 = math.exp %73 : vector<8x32xf32>
    %cst_35 = arith.constant 1.000000e+00 : f32
    %75 = vector.broadcast %cst_35 : f32 to vector<8x32xf32>
    %76 = arith.addf %75, %74 : vector<8x32xf32>
    %77 = arith.divf %75, %76 : vector<8x32xf32>
    %78 = arith.mulf %66, %77 : vector<8x32xf32>
    %c1_i32 = arith.constant 1 : i32
    %79 = arith.addi %arg1, %c1_i32 : i32
    %c16_i32 = arith.constant 16 : i32
    %80 = arith.muli %79, %c16_i32 : i32
    %81 = tpu.iota {dimensions = array<i32: 0>} : vector<8x1xi32>
    %82 = vector.broadcast %80 : i32 to vector<8x1xi32>
    %83 = arith.addi %82, %81 : vector<8x1xi32>
    %c16_i32_36 = arith.constant 16 : i32
    %84 = vector.broadcast %c16_i32_36 : i32 to vector<8x1xi32>
    %85 = arith.cmpi slt, %83, %84 : vector<8x1xi32>
    %cst_37 = arith.constant 0.000000e+00 : f32
    %86 = vector.shape_cast %85 : vector<8x1xi1> to vector<8x1xi1>
    %87 = vector.broadcast %86 : vector<8x1xi1> to vector<8x32xi1>
    %88 = vector.broadcast %cst_37 : f32 to vector<8x32xf32>
    %89 = arith.select %87, %78, %88 : vector<8x32xi1>, vector<8x32xf32>
    %90 = vector.extract_strided_slice %89 {offsets = [0, 0], sizes = [2, 32], strides = [1, 1]} : vector<8x32xf32> to vector<2x32xf32>
    %c24 = arith.constant 24 : index
    %c0_38 = arith.constant 0 : index
    %91 = vector.load %arg12[%c24, %c0_38] : memref<32x32xf32, #tpu.memory_space<vmem>>, vector<2x32xf32>
    tpu.vector_store %arg12[%c24, %c0_38], %90 {strides = array<i32>} : memref<32x32xf32, #tpu.memory_space<vmem>>, vector<2x32xf32>,
    %c0_39 = arith.constant 0 : index
    %c0_40 = arith.constant 0 : index
    %92 = vector.load %arg9[%c0_39, %c0_40] : memref<5x32xf32, #tpu.memory_space<vmem>>, vector<5x32xf32>
    %c0_41 = arith.constant 0 : index
    %c0_42 = arith.constant 0 : index
    %93 = vector.load %arg12[%c0_41, %c0_42] : memref<32x32xf32, #tpu.memory_space<vmem>>, vector<24x32xf32>
    %c18_i32 = arith.constant 18 : i32
    %94 = tpu.dynamic_rotate %93 by %c18_i32 dim 0 : vector<24x32xf32>, i32 -> vector<24x32xf32>
    %95 = vector.extract_strided_slice %94 {offsets = [0, 0], sizes = [16, 32], strides = [1, 1]} : vector<24x32xf32> to vector<16x32xf32>
    %96 = vector.extract_strided_slice %92 {offsets = [0, 0], sizes = [1, 32], strides = [1, 1]} : vector<5x32xf32> to vector<1x32xf32>
    %97 = vector.broadcast %96 : vector<1x32xf32> to vector<16x32xf32>
    %98 = arith.mulf %95, %97 : vector<16x32xf32>
    %c17_i32 = arith.constant 17 : i32
    %99 = tpu.dynamic_rotate %93 by %c17_i32 dim 0 : vector<24x32xf32>, i32 -> vector<24x32xf32>
    %100 = vector.extract_strided_slice %99 {offsets = [0, 0], sizes = [16, 32], strides = [1, 1]} : vector<24x32xf32> to vector<16x32xf32>
    %101 = vector.extract_strided_slice %92 {offsets = [1, 0], sizes = [1, 32], strides = [1, 1]} : vector<5x32xf32> to vector<1x32xf32>
    %102 = vector.broadcast %101 : vector<1x32xf32> to vector<16x32xf32>
    %103 = arith.mulf %100, %102 : vector<16x32xf32>
    %c8_43 = arith.constant 8 : index
    %c0_44 = arith.constant 0 : index
    %104 = vector.load %arg12[%c8_43, %c0_44] : memref<32x32xf32, #tpu.memory_space<vmem>>, vector<24x32xf32>
    %105 = vector.extract_strided_slice %104 {offsets = [0, 0], sizes = [16, 32], strides = [1, 1]} : vector<24x32xf32> to vector<16x32xf32>
    %106 = vector.extract_strided_slice %92 {offsets = [2, 0], sizes = [1, 32], strides = [1, 1]} : vector<5x32xf32> to vector<1x32xf32>
    %107 = vector.broadcast %106 : vector<1x32xf32> to vector<16x32xf32>
    %108 = arith.mulf %105, %107 : vector<16x32xf32>
    %109 = arith.addf %98, %108 : vector<16x32xf32>
    %c23_i32 = arith.constant 23 : i32
    %110 = tpu.dynamic_rotate %104 by %c23_i32 dim 0 : vector<24x32xf32>, i32 -> vector<24x32xf32>
    %111 = vector.extract_strided_slice %110 {offsets = [0, 0], sizes = [16, 32], strides = [1, 1]} : vector<24x32xf32> to vector<16x32xf32>
    %112 = vector.extract_strided_slice %92 {offsets = [3, 0], sizes = [1, 32], strides = [1, 1]} : vector<5x32xf32> to vector<1x32xf32>
    %113 = vector.broadcast %112 : vector<1x32xf32> to vector<16x32xf32>
    %114 = arith.mulf %111, %113 : vector<16x32xf32>
    %115 = arith.addf %103, %114 : vector<16x32xf32>
    %c22_i32 = arith.constant 22 : i32
    %116 = tpu.dynamic_rotate %104 by %c22_i32 dim 0 : vector<24x32xf32>, i32 -> vector<24x32xf32>
    %117 = vector.extract_strided_slice %116 {offsets = [0, 0], sizes = [16, 32], strides = [1, 1]} : vector<24x32xf32> to vector<16x32xf32>
    %118 = vector.extract_strided_slice %92 {offsets = [4, 0], sizes = [1, 32], strides = [1, 1]} : vector<5x32xf32> to vector<1x32xf32>
    %119 = vector.broadcast %118 : vector<1x32xf32> to vector<16x32xf32>
    %120 = arith.mulf %117, %119 : vector<16x32xf32>
    %121 = arith.addf %109, %120 : vector<16x32xf32>
    %122 = arith.addf %121, %115 : vector<16x32xf32>
    %c0_45 = arith.constant 0 : index
    %c0_46 = arith.constant 0 : index
    %123 = vector.load %arg10[%c0_45, %c0_46] : memref<1x32xf32, #tpu.memory_space<vmem>>, vector<1x32xf32>
    %124 = vector.broadcast %123 : vector<1x32xf32> to vector<16x32xf32>
    %125 = arith.addf %122, %124 : vector<16x32xf32>
    %cst_47 = arith.constant 0.000000e+00 : f32
    %126 = vector.broadcast %cst_47 : f32 to vector<16x32xf32>
    %127 = arith.maximumf %125, %126 : vector<16x32xf32>
    %c0_48 = arith.constant 0 : index
    %128 = memref.load %arg2[%c0_48] : memref<2xf32, #tpu.memory_space<smem>>
    %129 = vector.broadcast %128 : f32 to vector<16x32xf32>
    %130 = arith.mulf %129, %127 : vector<16x32xf32>
    %c1 = arith.constant 1 : index
    %131 = memref.load %arg2[%c1] : memref<2xf32, #tpu.memory_space<smem>>
    %132 = vector.broadcast %131 : f32 to vector<16x32xf32>
    %133 = arith.addf %130, %132 : vector<16x32xf32>
    %c0_49 = arith.constant 0 : index
    %c0_50 = arith.constant 0 : index
    %c0_51 = arith.constant 0 : index
    %134 = vector.load %arg11[%c0_49, %c0_50, %c0_51] : memref<1x16x32xf32, #tpu.memory_space<vmem>>, vector<1x16x32xf32>
    %135 = vector.shape_cast %134 : vector<1x16x32xf32> to vector<16x32xf32>
    %136 = vector.shape_cast %133 : vector<16x32xf32> to vector<1x16x32xf32>
    tpu.vector_store %arg11[%c0_49, %c0_50, %c0_51], %136 {strides = array<i32>} : memref<1x16x32xf32, #tpu.memory_space<vmem>>, vector<1x16x32xf32>,
    return
  }
  func.func @transform_0(%arg0: i32, %arg1: i32) -> i32 {
    %c0_i32 = arith.constant 0 : i32
    %c0_i32_0 = arith.constant 0 : i32
    return %c0_i32 : i32
  }
  func.func @transform_1(%arg0: i32, %arg1: i32) -> (i32, i32, i32) {
    %c0_i32 = arith.constant 0 : i32
    %c0_i32_0 = arith.constant 0 : i32
    return %arg0, %arg1, %c0_i32 : i32, i32, i32
  }
  func.func @transform_2(%arg0: i32, %arg1: i32) -> (i32, i32, i32) {
    %c1_i32 = arith.constant 1 : i32
    %0 = arith.addi %arg1, %c1_i32 : i32
    %c2_i32 = arith.constant 2 : i32
    %1 = arith.muli %0, %c2_i32 : i32
    %c1_i32_0 = arith.constant 1 : i32
    %2 = arith.minsi %1, %c1_i32_0 : i32
    %c0_i32 = arith.constant 0 : i32
    %c0_i32_1 = arith.constant 0 : i32
    return %arg0, %2, %c0_i32 : i32, i32, i32
  }
  func.func @transform_3(%arg0: i32, %arg1: i32) -> (i32, i32) {
    %c0_i32 = arith.constant 0 : i32
    %c0_i32_0 = arith.constant 0 : i32
    %c0_i32_1 = arith.constant 0 : i32
    return %c0_i32, %c0_i32_0 : i32, i32
  }
  func.func @transform_4(%arg0: i32, %arg1: i32) -> (i32, i32) {
    %c0_i32 = arith.constant 0 : i32
    %c0_i32_0 = arith.constant 0 : i32
    %c0_i32_1 = arith.constant 0 : i32
    return %c0_i32, %c0_i32_0 : i32, i32
  }
  func.func @transform_5(%arg0: i32, %arg1: i32) -> (i32, i32) {
    %c0_i32 = arith.constant 0 : i32
    %c0_i32_0 = arith.constant 0 : i32
    %c0_i32_1 = arith.constant 0 : i32
    return %c0_i32, %c0_i32_0 : i32, i32
  }
  func.func @transform_6(%arg0: i32, %arg1: i32) -> (i32, i32) {
    %c0_i32 = arith.constant 0 : i32
    %c0_i32_0 = arith.constant 0 : i32
    %c0_i32_1 = arith.constant 0 : i32
    return %c0_i32, %c0_i32_0 : i32, i32
  }
  func.func @transform_7(%arg0: i32, %arg1: i32) -> (i32, i32) {
    %c0_i32 = arith.constant 0 : i32
    %c0_i32_0 = arith.constant 0 : i32
    %c0_i32_1 = arith.constant 0 : i32
    return %c0_i32, %c0_i32_0 : i32, i32
  }
  func.func @transform_8(%arg0: i32, %arg1: i32) -> (i32, i32) {
    %c0_i32 = arith.constant 0 : i32
    %c0_i32_0 = arith.constant 0 : i32
    %c0_i32_1 = arith.constant 0 : i32
    return %c0_i32, %c0_i32_0 : i32, i32
  }
  func.func @transform_9(%arg0: i32, %arg1: i32) -> (i32, i32, i32) {
    %c0_i32 = arith.constant 0 : i32
    %c0_i32_0 = arith.constant 0 : i32
    return %arg0, %arg1, %c0_i32 : i32, i32, i32
  }
}

</mosaic_0001>

<bundles_post_ra>
// kernel: tpu_custom_call.1
= control target key start
LH: loop header
LB: loop body
LE: loop exit
PB: predicated region body
PF: predicated region fallthrough
CT: control target
= control target key end

     0   :  { %s1465_s0 = inlined_call_operand.hbm [shape: f32[2], index: 0, kind: input, shape index: {}]   ;;  %s1466_s1 = inlined_call_operand.hbm [shape: f32[2,16,32], index: 1, kind: input, shape index: {}]   ;;  %s1467_s2 = inlined_call_operand.hbm [shape: f32[2,16,32], index: 2, kind: input, shape index: {}]   ;;  %s1468_s3 = inlined_call_operand.vmem [shape: f32[1,32], index: 3, kind: input, shape index: {}]   ;;  %s1469_s4 = inlined_call_operand.vmem [shape: f32[1,32], index: 4, kind: input, shape index: {}]   ;;  %s1470_s5 = inlined_call_operand.vmem [shape: f32[1,32], index: 5, kind: input, shape index: {}]   ;;  %s1471_s6 = inlined_call_operand.vmem [shape: f32[1,32], index: 6, kind: input, shape index: {}]   ;;  %s1472_s7 = inlined_call_operand.vmem [shape: f32[5,32], index: 7, kind: input, shape index: {}]   ;;  %s1473_s8 = inlined_call_operand.vmem [shape: f32[1,32], index: 8, kind: input, shape index: {}]   ;;  %s1474_s9 = inlined_call_operand.hbm [shape: f32[2,16,32], index: 9, kind: output, shape index: {}]  }
   0x1   :  { %1487 = sst [smem:[#allocation21_spill]] %s1465_s0 }
   0x2   :  { %1488 = sst [smem:[#allocation22_spill]] %s1466_s1 }
   0x3   :  { %1489 = sst [smem:[#allocation23_spill]] %s1474_s9 }
   0x4   :  { %14 = vsyncpa [#allocation6], 0 }
   0x5   :  { %15 = vsyncpa [#allocation4], 0 }
   0x6   :  { %17 = vsyncpa [#allocation4 + $0x1], 0 }
   0x7   :  { %18 = vsyncpa [#allocation9], 0 }
   0x8   :  { %20 = vsyncpa [#allocation9 + $0x1], 0 }
   0x9   :  { %21 = vsyncpa [#allocation5], 0 }
   0xa   :  { %23 = vsyncpa [#allocation5 + $0x1], 0  ;;  %s1186_s30 = smov 0   ;;  %s1188_s10 = smov 0  }
   0xb   :  { %s1190_s11 = smov 0   ;;  %s1192_s12 = smov 0  }
   0xc   :  { %s1194_s13 = smov 0   ;;  %s1196_s14 = smov 0  }
   0xd LB: > { %1490 = sst [smem:[#allocation15_spill]] %s1105_s30  ;;  %s828_s15 = sadd.s32 4294967295, %s1125_s14   ;;  %s1125_s14 = sphi %s1196_s14, %s29_s14   ;;  %s1121_s13 = sphi %s1194_s13, %s1521_s13   ;;  %s1117_s12 = sphi %s1192_s12, %s1520_s12   ;;  %s1113_s11 = sphi %s1190_s11, %s1516_s11   ;;  %s1109_s10 = sphi %s1188_s10, %s1519_s10   ;;  %s1105_s30 = sphi %s1186_s30, %s1518_s30  }
   0xe   : > { %1491 = sst [smem:[#allocation16_spill]] %s1113_s11  ;;  %s829_s16 = sadd.s32 4294967294, %s1125_s14  }
   0xf   : > { %1492 = sst [smem:[#allocation17_spill]] %s1125_s14  ;;  %p78_p0 = scmp.ne.s32.totalorder %s1113_s11, %s1109_s10 }
  0x10   : > { %p79_p1 = scmp.eq.s32.totalorder %s1125_s14, 0  ;;  %p84_p2 = scmp.ne.s32.totalorder %s1109_s10, %s1105_s30 }
  0x11   : > { %p1224_p3 = scmp.eq.s32.totalorder %s828_s15, 0  ;;  %p272_p4 = scmp.eq.s32.totalorder %s828_s15, 1 }
  0x12   : > { %p80_p5 = por %p79_p1, %p78_p0  ;;  %p278_p6 = scmp.eq.s32.totalorder %s829_s16, 1 }
  0x13   : > { %s1493_s18 = scalar_select %p1224_p3, 1, 0 }
  0x14   : > { %p1230_p7 = por %p1224_p3, %p84_p2  ;;  %p1234_p8 = por %p272_p4, %p78_p0 }
  0x15   : > { %p1238_p9 = por %p278_p6, %p84_p2  ;;  %p830_p10 = scmp.ge.s32.totalorder %s1125_s14, 1 }
  0x16   : > { %s1494_s19 = scalar_select %p1230_p7, 1, 0 }
  0x17   : > { %s1495_s20 = scalar_select %p1234_p8, 1, 0 }
  0x18   : > { %s1496_s21 = scalar_select %p1238_p9, 1, 0 }
  0x19   : > { %p285_p11 = scmp.lt.s32.totalorder %s1125_s14, 3  ;;  %p893_p1 = scmp.lt.s32.totalorder %s1125_s14, 2 }
  0x1a   : > { %1497 = sst [smem:[#allocation18_spill]] %s1496_s21  ;;  %s1251_s23 = sand.u32 1, %s1113_s11  }
  0x1b   : > { %p1245_p13 = pnand %p830_p10, %p285_p11  ;;  %p1255_p4 = pnand %p893_p1, %p80_p5 }
  0x1c   : > { %s41_s25 = sadd.s32 1, %s1121_s13  ;;  %s833_s26 = sshll.u32 %s1251_s23, 4 }
  0x1d   : > { %s1498_s22 = scalar_select %p1245_p13, 1, 0 }
  0x1e   : > { %p877_p0 = pneg %p1245_p13  ;;  %p43_p6 = scmp.ge.s32.totalorder %s41_s25, 2 }
  0x1f   : > { %s1500_s0 = sld [smem:[#allocation21_spill]] }
  0x20   : > { %p878_p2 = pnand %p877_p0, %p1224_p3 }
  0x22   : > { %p964_p11 = pneg %p878_p2 }
  0x25   : > { %s962_s29 = scalar_lea.hbm %s1500_s0, 16 }
  0x26   : > { %p963_p10 = scmp.ne.s32.totalorder %s1500_s0, %s962_s29  ;;  %p969_p5 = scmp.lt.u32.totalorder %s962_s29, %s1500_s0 }
  0x28   : > { %p965_p12 = pnand %p964_p11, %p963_p10 }
  0x2a   : > { %p966_p9 = pneg %p965_p12 }
  0x2c   : > { %p971_p1 = pnand %p969_p5, %p966_p9 }
  0x2e   : > { %974 = shalt.err (!%p971_p1)
}
  0x2f   : > { %s1127_s21 = smov [#allocation3]   ;;  %s1523_s25 = smov (%p43_p6, %s41_s25), 0 }
  0x30   : > { %880 = dma.hbm_to_smem (!%p878_p2), %s1500_s0, 16, %s1127_s21, [#allocation6]  }
  0x31   : > { %1501 = sst [smem:[#allocation19_spill]] %s1523_s25  ;;  %s862_s14 = sshll.u32 %s1121_s13, 8 }
  0x32   : > { %s66_s17 = ssub.s32 %s1121_s13, %s1523_s25  ;;  %s1502_s1 = sld [smem:[#allocation22_spill]] }
  0x33   : > { %p69_p9 = scmp.eq.s32.totalorder %s66_s17, 0  ;;  %s329_s9 = scalar_lea.vmem [#allocation7], %s833_s26 }
  0x34   : > { %s338_s30 = sshll.u32 %s329_s9, 4  ;;  %s1503_s21 = sadd.s32 1, %s1113_s11  ;;  %s1287_s30 = int_to_ptr.vmem [resolvable:$true] %s338_s30 }
  0x35   : > { %s1292_s15 = scalar_select %p69_p9, %s1113_s11, %s1503_s21  }
  0x36   : > { %s326_s16 = scalar_lea.sflag [#allocation4], %s1251_s23  ;;  %p977_p0 = pneg %p1255_p4 }
  0x37   : > { %1504 = sst [smem:[#allocation20_spill]] %s1292_s15 }
  0x38   : > { %s1285_s29 = scalar_lea.hbm %s1502_s1, %s862_s14  ;;  %s980_s17 = scalar_lea.hbm %s1502_s1, 512 }
  0x39   : > { %s975_s0 = scalar_lea.hbm %s1285_s29, 256  ;;  %p981_p10 = scmp.lt.u32.totalorder %s1285_s29, %s1502_s1 }
  0x3a   : > { %p976_p12 = scmp.ne.s32.totalorder %s1285_s29, %s975_s0  ;;  %p982_p11 = scmp.lt.u32.totalorder %s980_s17, %s975_s0 }
  0x3b   : > { %p984_p1 = scmp.lt.u32.totalorder %s975_s0, %s1285_s29 }
  0x3c   : > { %p978_p2 = pnand %p977_p0, %p976_p12  ;;  %p983_p5 = por %p982_p11, %p981_p10 }
  0x3e   : > { %p979_p6 = pneg %p978_p2  ;;  %p985_p9 = por %p984_p1, %p983_p5 }
  0x40   : > { %p986_p8 = pnand %p985_p9, %p979_p6 }
  0x42   : > { %989 = shalt.err (!%p986_p8)
}
  0x43   : > { %s990_s21 = scalar_lea.vmem %s1287_s30, 256  ;;  %s1128_s27 = smov [#allocation7]  }
  0x44   : > { %p991_p12 = scmp.ne.s32.totalorder %s1287_s30, %s990_s21  ;;  %s995_s28 = sshll.u32 %s1128_s27, 4  ;;  %s996_s28 = int_to_ptr.vmem [resolvable:$false] %s995_s28 }
  0x45   : > { %s997_s26 = scalar_lea.vmem %s996_s28, 512  ;;  %p998_p3 = scmp.lt.s32.totalorder %s1287_s30, %s996_s28 }
  0x46   : > { %p993_p2 = pnand %p991_p12, %p977_p0  ;;  %p999_p10 = scmp.lt.s32.totalorder %s997_s26, %s990_s21 }
  0x48   : > { %p994_p7 = pneg %p993_p2  ;;  %p1000_p11 = por %p999_p10, %p998_p3 }
  0x4a   : > { %p1001_p5 = pnand %p1000_p11, %p994_p7 }
  0x4c   : > { %1004 = shalt.err (!%p1001_p5)
}
  0x4d   : > { %s1129_s0 = smov 128   ;;  %s1130_s17 = smov 8  }
  0x4e   : > { %884 = dma.hbm_to_vmem [thread:$0]  (!%p1255_p4), %s1285_s29, 256, %s1287_s30, %s326_s16, %s1129_s0, %s1129_s0, %s1130_s17  }
  0x4f   : > { %s836_s9 = sshll.u32 %s1251_s23, 3  ;;  %s864_s27 = sadd.s32 128, %s862_s14 }
  0x50   : > { %s1328_s26 = scalar_lea.hbm %s1467_s2, %s864_s27  ;;  %s352_s1 = scalar_lea.vmem [#allocation8], %s836_s9 }
  0x51   : > { %s365_s25 = sshll.u32 %s352_s1, 4  ;;  %s349_s15 = scalar_lea.sflag [#allocation9], %s1251_s23  ;;  %s366_s25 = int_to_ptr.vmem [resolvable:$true] %s365_s25 }
  0x52   : > { %s1005_s11 = scalar_lea.hbm %s1328_s26, 128  ;;  %s1010_s30 = scalar_lea.hbm %s1467_s2, 512 }
  0x53   : > { %p1006_p3 = scmp.ne.s32.totalorder %s1328_s26, %s1005_s11  ;;  %p1011_p6 = scmp.lt.u32.totalorder %s1328_s26, %s1467_s2 }
  0x54   : > { %p1012_p1 = scmp.lt.u32.totalorder %s1010_s30, %s1005_s11  ;;  %p1014_p12 = scmp.lt.u32.totalorder %s1005_s11, %s1328_s26 }
  0x55   : > { %p1008_p7 = pnand %p1006_p3, %p977_p0 }
  0x56   : > { %p1013_p9 = por %p1012_p1, %p1011_p6 }
  0x57   : > { %p1009_p8 = pneg %p1008_p7 }
  0x58   : > { %p1015_p2 = por %p1014_p12, %p1013_p9 }
  0x5a   : > { %p1016_p10 = pnand %p1015_p2, %p1009_p8 }
  0x5c   : > { %1019 = shalt.err (!%p1016_p10)
}
  0x5d   : > { %s1020_s1 = scalar_lea.vmem %s366_s25, 128  ;;  %s1131_s23 = smov [#allocation8]  }
  0x5e   : > { %p1021_p11 = scmp.ne.s32.totalorder %s366_s25, %s1020_s1  ;;  %s1025_s17 = sshll.u32 %s1131_s23, 4  ;;  %s1026_s17 = int_to_ptr.vmem [resolvable:$false] %s1025_s17 }
  0x5f   : > { %s1027_s9 = scalar_lea.vmem %s1026_s17, 256  ;;  %p1028_p7 = scmp.lt.s32.totalorder %s366_s25, %s1026_s17 }
  0x60   : > { %p1023_p5 = pnand %p1021_p11, %p977_p0  ;;  %p1029_p13 = scmp.lt.s32.totalorder %s1027_s9, %s1020_s1 }
  0x62   : > { %p1024_p3 = pneg %p1023_p5  ;;  %p1030_p1 = por %p1029_p13, %p1028_p7 }
  0x64   : > { %p1031_p6 = pnand %p1030_p1, %p1024_p3 }
  0x66   : > { %1034 = shalt.err (!%p1031_p6)
}
  0x67   : > { %887 = dma.hbm_to_vmem [thread:$0]  (!%p1255_p4), %s1328_s26, 128, %s366_s25, %s349_s15  }
  0x68   : > { %p1505_p8 = scmp.ne.s32.totalorder %s1498_s22, 0 }
  0x69   : > { %p1506_p9 = scmp.ne.s32.totalorder (!%p1505_p8), %s1493_s18, 0 }
  0x6a   : > { %374 = sbr.rel (%p1505_p8) target bundleno = 510 (0x1fe), region = 56 }
  0x71   : > { %1088 = dma.done.wait (%p1506_p9), [#allocation6], 16  }
  0x72   : > { %1090 = vsyncadd (%p1506_p9), [#allocation6], 4294967280  ;;  %s1357_s11 = sand.u32 1, %s1109_s10   ;;  %p1507_p13 = scmp.ne.s32.totalorder %s1494_s19, 0 }
  0x73   : > { %s841_s27 = sshll.u32 %s1357_s11, 4  ;;  %s381_s24 = scalar_lea.sflag [#allocation4], %s1357_s11 }
  0x74   : > { %s384_s25 = scalar_lea.vmem [#allocation7], %s841_s27 }
  0x75   : > { %1092 = dma.done.wait (%p1507_p13), %s381_s24, 256  }
  0x76   : > { %1094 = vsyncadd (%p1507_p13), %s381_s24, 4294967040  ;;  %s390_s18 = scalar_lea.sflag [#allocation9], %s1357_s11 }
  0x77   : > { %1096 = dma.done.wait (%p1507_p13), %s390_s18, 128  }
  0x78   : > { %1098 = vsyncadd (%p1507_p13), %s390_s18, 4294967168 }
  0x79   : > { %398 = sfence }
  0x7a   : > { %vm444_vm0 = vcmask 261120   ;;  %v454_v0 = vld [vmem:[%s384_s25] sm:$0xff]  ;;  %vm598_vm1 = vcmask 254976   ;;  %v455_v1 = vld [vmem:[%s384_s25 + $0x8] sm:$0xff]  ;;  %v1132_v3 = vmov 0.0   ;;  %v590_v43 = vlaneseq  ;;  %s678_s0 = sld [smem:[#allocation3]] }
  0x7b   : > { %v457_v2 = vsel %vm444_vm0, %v454_v0, 0.0  ;;  %445 = vst.msk [vmem:[#allocation2] sm:$0xff] %vm444_vm0, %v1132_v3  ;;  %446 = vst.msk [vmem:[#allocation2 + $0x18] sm:$0xff] %vm444_vm0, %v1132_v3  ;;  %v460_v4 = vsel %vm444_vm0, %v455_v1, 0.0  ;;  %v846_v22 = vld [vmem:[%s1470_s5] ss:$0 sm:$0xff] }
  0x7c   : > { %458 = vadd.xlane.f32.xlu0 %v457_v2  ;;  %599 = vst.msk [vmem:[#allocation2 + $0x18] sm:$0x3] %vm598_vm1, %v1132_v3  ;;  %v847_v24 = vld [vmem:[%s1471_s6] ss:$0 sm:$0xff]  ;;  %v591_v47 = vshrl.u32 %v590_v43, 7  ;;  %s856_s1 = sld [smem:[#allocation3 + $0x1]] }
  0x7d   : > { %v844_v36 = vld [vmem:[%s1468_s3] ss:$0 sm:$0xff]  ;;  %s865_s9 = sshll.u32 %s1117_s12, 8  ;;  %s433_s24 = scalar_lea.vmem [#allocation10], %s841_s27 }
  0x7e   : > { %v845_v39 = vld [vmem:[%s1469_s4] ss:$0 sm:$0xff]  ;;  %v612_v50 = vsub.s32 0, %v591_v47  ;;  %v624_v51 = vsub.s32 1, %v591_v47  ;;  %v631_v52 = vsub.s32 2, %v591_v47  ;;  %v645_v55 = vsub.s32 3, %v591_v47 }
  0x7f   : > { %v600_v53 = vld [vmem:[%s1472_s7] sm:$0x1f]  ;;  %vm607_vm2 = vcmp.lt.s32.totalorder %v591_v47, 2  ;;  %v659_v58 = vsub.s32 4, %v591_v47  ;;  %vm619_vm3 = vcmp.lt.s32.totalorder %v591_v47, 1  ;;  %vm640_vm4 = vcmp.lt.s32.totalorder %v591_v47, 7 }
  0x80   : > { %461 = vadd.xlane.f32.xlu0 %v460_v4  ;;  %v613_v62 = vrot.slane %v600_v53, %v612_v50  ;;  %v625_v63 = vrot.slane %v600_v53, %v624_v51  ;;  %v646_v3 = vrot.slane %v600_v53, %v645_v55  ;;  %vm654_vm5 = vcmp.lt.s32.totalorder %v591_v47, 6  ;;  %s704_s25 = sshll.u32 %s433_s24, 4  ;;  %s1508_s22 = sld [smem:[#allocation23_spill]]  ;;  %s1414_s25 = int_to_ptr.vmem [resolvable:$true] %s704_s25 }
  0x81   : > { %s689_s12 = scalar_lea.sflag [#allocation5], %s1357_s11  ;;  %s1035_s27 = scalar_lea.vmem %s1414_s25, 256 }
  0x82   : > { %v601_v49 = vld [vmem:[#allocation2] sm:$0xff]  ;;  %p1036_p4 = scmp.ne.s32.totalorder %s1414_s25, %s1035_s27  ;;  %p1509_p0 = scmp.ne.s32.totalorder %s1495_s20, 0 }
  0x83   : > { %v604_v54 = vrot.slane %v601_v49, 6  ;;  %v628_v57 = vld [vmem:[#allocation2 + $0x18] sm:$0xff]  ;;  %v616_v60 = vrot.slane %v601_v49, 7  ;;  %s1133_s21 = smov [#allocation10]  }
  0x84   : > { %v639_v2 = vrot.slane %v628_v57, 1  ;;  %p1037_p12 = pnand %p1036_p4, %p1509_p0  ;;  %s1039_s28 = sshll.u32 %s1133_s21, 4  ;;  %s1040_s28 = int_to_ptr.vmem [resolvable:$false] %s1039_s28 }
  0x85   : > { %s1041_s26 = scalar_lea.vmem %s1040_s28, 512  ;;  %p1042_p10 = scmp.lt.s32.totalorder %s1414_s25, %s1040_s28 }
  0x86   : > { %s1412_s15 = scalar_lea.hbm %s1508_s22, %s865_s9  ;;  %p1038_p2 = pneg %p1037_p12 }
  0x87   : > { %p1043_p11 = scmp.lt.s32.totalorder %s1041_s26, %s1035_s27 }
  0x89   : > { %p1044_p5 = por %p1043_p11, %p1042_p10 }
  0x8b   : > { %p1045_p3 = pnand %p1044_p5, %p1038_p2 }
 0x109   : > { %v459_v5 = vpop.xlane.xlu0 %458 }
 0x10a   : > { %v463_v6 = vmul.f32 0.03125, %v459_v5 }
 0x10c   : > { %v465_v7 = vsub.f32 %v454_v0, %v463_v6  ;;  %v632_v0 = vrot.slane %v600_v53, %v631_v52  ;;  %v653_v6 = vrot.slane %v628_v57, 2 }
 0x10d   : > { %v462_v8 = vpop.xlane.xlu0 %461 }
 0x10e   : > { %v464_v9 = vmul.f32 0.03125, %v462_v8  ;;  %v467_v10 = vmul.f32 %v465_v7, %v465_v7 }
 0x110   : > { %v466_v11 = vsub.f32 %v455_v1, %v464_v9  ;;  %v469_v12 = vsel %vm444_vm0, %v467_v10, 0.0 }
 0x111   : > { %470 = vadd.xlane.f32.xlu1 %v469_v12 }
 0x112   : > { %v468_v13 = vmul.f32 %v466_v11, %v466_v11 }
 0x114   : > { %v472_v14 = vsel %vm444_vm0, %v468_v13, 0.0 }
 0x115   : > { %473 = vadd.xlane.f32.xlu1 %v472_v14 }
 0x19e   : > { %v471_v15 = vpop.xlane.xlu1 %470 }
 0x19f   : > { %v475_v16 = vmul.f32 0.03125, %v471_v15 }
 0x1a1   : > { %v477_v17 = vadd.f32 1e-05, %v475_v16 }
 0x1a2   : > { %v474_v18 = vpop.xlane.xlu1 %473 }
 0x1a3   : > { %950 = vrsqrt.f32 %v477_v17  ;;  %v476_v19 = vmul.f32 0.03125, %v474_v18 }
 0x1a5   : > { %v478_v20 = vadd.f32 1e-05, %v476_v19 }
 0x1a7   : > { %952 = vrsqrt.f32 %v478_v20 }
 0x1ad   : > { %v951_v21 = vpop.eup %950 }
 0x1ae   : > { %v481_v23 = vmul.f32 %v951_v21, %v465_v7  ;;  %v660_v7 = vrot.slane %v600_v53, %v659_v58 }
 0x1b0   : > { %v508_v25 = vmul.f32 %v846_v22, %v481_v23  ;;  %v490_v38 = vmul.f32 %v844_v36, %v481_v23 }
 0x1b1   : > { %v953_v26 = vpop.eup %952 }
 0x1b2   : > { %v517_v27 = vadd.f32 %v847_v24, %v508_v25  ;;  %v482_v28 = vmul.f32 %v953_v26, %v466_v11  ;;  %v499_v40 = vadd.f32 %v845_v39, %v490_v38 }
 0x1b4   : > { %v848_v29 = vmul.f32 -1.442695, %v517_v27  ;;  %v509_v30 = vmul.f32 %v846_v22, %v482_v28  ;;  %v491_v41 = vmul.f32 %v844_v36, %v482_v28  ;;  %v855_v36 = vld [vmem:[%s1473_s8] ss:$0 sm:$0xff] }
 0x1b6   : > { %954 = vpow2.f32 %v848_v29  ;;  %v518_v31 = vadd.f32 %v847_v24, %v509_v30  ;;  %v500_v45 = vadd.f32 %v845_v39, %v491_v41  ;;  %v679_v41 = vstv %s678_s0 }
 0x1b8   : > { %v849_v32 = vmul.f32 -1.442695, %v518_v31 }
 0x1ba   : > { %956 = vpow2.f32 %v849_v32 }
 0x1c0   : > { %v955_v33 = vpop.eup %954 }
 0x1c1   : > { %v525_v34 = vadd.f32 1.0, %v955_v33 }
 0x1c3   : > { %958 = vrcp.f32 %v525_v34 }
 0x1c4   : > { %v957_v35 = vpop.eup %956 }
 0x1c5   : > { %v526_v37 = vadd.f32 1.0, %v957_v35 }
 0x1c7   : > { %960 = vrcp.f32 %v526_v37 }
 0x1cd   : > { %v959_v42 = vpop.eup %958 }
 0x1ce   : > { %v531_v44 = vmul.f32 %v959_v42, %v499_v40 }
 0x1d0   : > { %533 = vst.msk [vmem:[#allocation2 + $0x8] sm:$0xff] %vm444_vm0, %v531_v44  ;;  %v683_v44 = vstv %s856_s1 }
 0x1d1   : > { %v961_v46 = vpop.eup %960 }
 0x1d2   : > { %v532_v48 = vmul.f32 %v961_v46, %v500_v45 }
 0x1d4   : > { %534 = vst.msk [vmem:[#allocation2 + $0x10] sm:$0xff] %vm444_vm0, %v532_v48 }
 0x1d7   : > { %v602_v56 = vld [vmem:[#allocation2 + $0x8] sm:$0xff] }
 0x1d8   : > { %v605_v59 = vrot.slane %v602_v56, 6  ;;  %v617_v61 = vrot.slane %v602_v56, 7  ;;  %v637_v5 = vrot.slane %v602_v56, 1  ;;  %v633_v13 = vmul.f32 %v632_v0, %v602_v56 }
 0x1d9   : > { %v651_v14 = vrot.slane %v602_v56, 2 }
 0x1da   : > { %v609_v1 = vsel %vm607_vm2, %v604_v54, %v605_v59  ;;  %v621_v10 = vsel %vm619_vm3, %v616_v60, %v617_v61 }
 0x1db   : > { %v603_v4 = vld [vmem:[#allocation2 + $0x10] sm:$0xff]  ;;  %v614_v12 = vmul.f32 %v613_v62, %v609_v1  ;;  %v626_v21 = vmul.f32 %v625_v63, %v621_v10 }
 0x1dc   : > { %v606_v8 = vrot.slane %v603_v4, 6  ;;  %v618_v9 = vrot.slane %v603_v4, 7  ;;  %v638_v11 = vrot.slane %v603_v4, 1  ;;  %v652_v15 = vrot.slane %v603_v4, 2 }
 0x1dd   : > { %v634_v22 = vmul.f32 %v632_v0, %v603_v4  ;;  %v635_v28 = vadd.f32 %v633_v13, %v614_v12 }
 0x1de   : > { %v608_v16 = vsel %vm607_vm2, %v605_v59, %v606_v8  ;;  %v620_v17 = vsel %vm619_vm3, %v617_v61, %v618_v9  ;;  %v641_v18 = vsel %vm640_vm4, %v638_v11, %v639_v2  ;;  %v642_v19 = vsel %vm640_vm4, %v637_v5, %v638_v11 }
 0x1df   : > { %v615_v20 = vmul.f32 %v613_v62, %v608_v16  ;;  %v647_v23 = vmul.f32 %v646_v3, %v642_v19  ;;  %v627_v24 = vmul.f32 %v625_v63, %v620_v17  ;;  %v648_v25 = vmul.f32 %v646_v3, %v641_v18 }
 0x1e0   : > { %v655_v26 = vsel %vm654_vm5, %v652_v15, %v653_v6  ;;  %v656_v27 = vsel %vm654_vm5, %v651_v14, %v652_v15 }
 0x1e1   : > { %v636_v29 = vadd.f32 %v634_v22, %v615_v20  ;;  %v649_v30 = vadd.f32 %v647_v23, %v626_v21  ;;  %v661_v31 = vmul.f32 %v660_v7, %v656_v27  ;;  %v662_v32 = vmul.f32 %v660_v7, %v655_v26 }
 0x1e2   : > { %v650_v34 = vadd.f32 %v648_v25, %v627_v24 }
 0x1e3   : > { %v663_v33 = vadd.f32 %v661_v31, %v635_v28  ;;  %v664_v35 = vadd.f32 %v662_v32, %v636_v29 }
 0x1e5   : > { %v665_v37 = vadd.f32 %v663_v33, %v649_v30  ;;  %v666_v38 = vadd.f32 %v664_v35, %v650_v34 }
 0x1e7   : > { %v674_v39 = vadd.f32 %v855_v36, %v665_v37  ;;  %v675_v40 = vadd.f32 %v855_v36, %v666_v38 }
 0x1e9   : > { %v676_v42 = vmax.f32 %v674_v39, 0.0  ;;  %v677_v43 = vmax.f32 %v675_v40, 0.0 }
 0x1eb   : > { %v680_v45 = vmul.f32 %v679_v41, %v676_v42  ;;  %v681_v46 = vmul.f32 %v679_v41, %v677_v43 }
 0x1ed   : > { %v684_v47 = vadd.f32 %v683_v44, %v680_v45  ;;  %v685_v48 = vadd.f32 %v683_v44, %v681_v46 }
 0x1ef   : > { %686 = vst.msk [vmem:[%s433_s24] sm:$0xff] %vm444_vm0, %v684_v47  ;;  %687 = vst.msk [vmem:[%s433_s24 + $0x8] sm:$0xff] %vm444_vm0, %v685_v48 }
 0x1f0   : > { %1048 = shalt.err (!%p1045_p3)
}
 0x1f1   : > { %s1049_s14 = scalar_lea.hbm %s1412_s15, 256  ;;  %s1053_s16 = scalar_lea.hbm %s1508_s22, 512 }
 0x1f2   : > { %p1050_p7 = scmp.ne.s32.totalorder %s1412_s15, %s1049_s14  ;;  %p1054_p8 = scmp.lt.u32.totalorder %s1412_s15, %s1508_s22 }
 0x1f3   : > { %p1055_p9 = scmp.lt.u32.totalorder %s1053_s16, %s1049_s14  ;;  %p1057_p4 = scmp.lt.u32.totalorder %s1049_s14, %s1412_s15 }
 0x1f4   : > { %p1051_p1 = pnand %p1050_p7, %p1509_p0 }
 0x1f5   : > { %p1056_p13 = por %p1055_p9, %p1054_p8 }
 0x1f6   : > { %p1052_p6 = pneg %p1051_p1 }
 0x1f7   : > { %p1058_p12 = por %p1057_p4, %p1056_p13 }
 0x1f9   : > { %p1059_p2 = pnand %p1058_p12, %p1052_p6 }
 0x1fb   : > { %1062 = shalt.err (!%p1059_p2)
}
 0x1fc   : > { %s1134_s23 = smov 128   ;;  %s1135_s17 = smov 8  }
 0x1fd   : > { %875 = dma.vmem_to_hbm [thread:$0]  (%p1509_p0), %s1414_s25, 256, %s1412_s15, %s689_s12, %s1134_s23, %s1134_s23, %s1135_s17  }
 0x1fe PF: > { %s1510_s9 = sld [smem:[#allocation15_spill]]  ;;  %s1511_s24 = sld [smem:[#allocation18_spill]] }
 0x1ff   : > { %s1512_s18 = sld [smem:[#allocation17_spill]] }
 0x204   : > { %s719_s19 = sand.u32 1, %s1510_s9   ;;  %p1513_p10 = scmp.ne.s32.totalorder %s1511_s24, 0 }
 0x205   : > { %p1514_p11 = scmp.ge.s32.totalorder %s1512_s18, 2  ;;  %s720_s27 = scalar_lea.sflag [#allocation5], %s719_s19 }
 0x207   : > { %p889_p5 = pnand %p1514_p11, %p1513_p10 }
 0x209   : > { %1100 = dma.done.wait (!%p889_p5), %s720_s27, 256  }
 0x20a   : > { %1102 = vsyncadd (!%p889_p5), %s720_s27, 4294967040  ;;  %s29_s14 = sadd.s32 1, %s1512_s18   ;;  %s1515_s21 = sld [smem:[#allocation16_spill]] }
 0x20b   : > { %p26_p3 = scmp.ge.s32.totalorder %s29_s14, 4   ;;  %s1516_s11 = sld [smem:[#allocation20_spill]] }
 0x20c   : > { %s1517_s20 = sld [smem:[#allocation19_spill]]  ;;  %s1518_s30 = smov %s1109_s10 }
 0x20d   : > { %s1520_s12 = smov %s1121_s13  ;;  %28 = sbr.rel (!%p26_p3) target bundleno = 13 (0xd), region = 127 }
 0x210   : > { %s1519_s10 = smov %s1515_s21 }
 0x212   : > { %s1521_s13 = smov %s1517_s20 }
 0x214   :  { %725 = vsyncpa [#allocation4], 1 }
 0x215   :  { %727 = vsyncpa [#allocation4 + $0x1], 1 }
 0x216   :  { %728 = vsyncpa [#allocation9], 1 }
 0x217   :  { %730 = vsyncpa [#allocation9 + $0x1], 1 }
 0x218   :  { %731 = vsyncpa [#allocation5], 1 }
 0x219   :  { %733 = vsyncpa [#allocation5 + $0x1], 1 }
 0x21a   :  { %734 = vsyncpa [#allocation6], 1 }
 0x21b   :  { %736 = vsyncpa [#allocation6 + $0x1], 1 }

</bundles_post_ra>
